<compile_context>
chip_gen: v7x
topology: tpu7x:2x2x1
jax: 0.10.0
libtpu: 0.0.40
codegen_flags: <defaults>
</compile_context>

<pallas_src>
import functools

import jax
import jax.numpy as jnp
from jax.experimental import pallas as pl
from jax.experimental.pallas import tpu as pltpu


def _round_up(x, m):
    return (x + m - 1) // m * m


def _patch_embed_kernel(x_ref, w_ref, b_ref, o_ref):
    # x_ref: (tm, K) bf16 patch rows, w_ref: (K, Np) bf16 weight (VMEM-resident),
    # b_ref: (1, Np) f32 bias, o_ref: (tm, Np) output (lane-dense, Np % 128 == 0).
    acc = jnp.dot(x_ref[...], w_ref[...], preferred_element_type=jnp.float32)
    o_ref[...] = (acc + b_ref[...]).astype(o_ref.dtype)


def _pick_tile_m(M, K, Np, in_bytes, out_bytes, budget_bytes):
    """Largest row tile (multiple of 8) whose double-buffered set fits VMEM budget."""
    resident = K * Np * in_bytes + Np * 4            # weight block + bias block
    for tm in (2048, 1024, 512, 256, 128, 64, 32, 16, 8):
        if tm > 8 and 2 * tm > max(M, 8):
            continue                                 # keep >= 2 grid steps (megacore)
        need = 2 * tm * (K * in_bytes + Np * out_bytes) + resident
        if need <= budget_bytes:
            return tm
    return 8


def _matmul_bias(patches, w, b, *, out_dtype):
    """patches: (M, K), w: (K, Np), b: (1, Np) -> (M, Np) token-major via Pallas."""
    M, K = patches.shape
    Np = w.shape[1]
    in_bytes = patches.dtype.itemsize
    out_bytes = jnp.dtype(out_dtype).itemsize

    # ~24 MiB for tiles + resident weight; fits v7x's 32 MiB scoped VMEM and is
    # far below v5e/v6e's 128 MiB physical.
    tile_budget = 24 * 1024 * 1024
    tm = _pick_tile_m(M, K, Np, in_bytes, out_bytes, tile_budget)

    M_pad = _round_up(M, tm)
    if M_pad != M:
        patches = jnp.pad(patches, ((0, M_pad - M), (0, 0)))

    cost = pl.CostEstimate(
        flops=2 * M_pad * K * Np,
        transcendentals=0,
        bytes_accessed=in_bytes * (M_pad * K + K * Np) + out_bytes * M_pad * Np,
    )

    out = pl.pallas_call(
        _patch_embed_kernel,
        out_shape=jax.ShapeDtypeStruct((M_pad, Np), out_dtype),
        grid_spec=pltpu.PrefetchScalarGridSpec(
            num_scalar_prefetch=0,
            grid=(M_pad // tm,),
            in_specs=[
                pl.BlockSpec((tm, K), lambda i: (i, 0)),
                pl.BlockSpec((K, Np), lambda i: (0, 0)),   # weight stays resident
                pl.BlockSpec((1, Np), lambda i: (0, 0)),   # bias stays resident
            ],
            out_specs=pl.BlockSpec((tm, Np), lambda i: (i, 0)),
        ),
        compiler_params=pltpu.CompilerParams(
            dimension_semantics=("parallel",),
            vmem_limit_bytes=32 * 1024 * 1024,
            # Fuse the im2col reshape/transpose/cast into the kernel's input DMA
            # rather than materializing `patches` in HBM.
            allow_input_fusion=[True, False, False],
        ),
        cost_estimate=cost,
    )(patches, w, b)

    return out[:M] if M_pad != M else out


def patch_embedding_forward(x, weight, bias, patch_size,
                            compute_dtype=jnp.bfloat16):
    """Equivalent of:
         y = Conv2d(C, E, kernel_size=p, stride=p)(x)   # NCHW, weight (E, C, p, p)
         return y.view(y.size(0), -1, y.size(-1))       # (B, E*H', W')
    """
    B, C, H, W = x.shape
    E = weight.shape[0]
    p = patch_size
    Hp, Wp = H // p, W // p
    M, K = B * Hp * Wp, C * p * p

    # Pad embedding (lane) dim to a multiple of 128 -> unmasked lane-dense stores.
    Np = _round_up(E, 128)

    # im2col, K ordered (c, kh, kw) to match the torch Conv2d weight layout.
    # With allow_input_fusion this chain fuses into the kernel's input DMA.
    xp = x.reshape(B, C, Hp, p, Wp, p)
    xp = jnp.transpose(xp, (0, 2, 4, 1, 3, 5))               # (B, H', W', C, p, p)
    patches = xp.reshape(M, K).astype(compute_dtype)         # (M, K) bf16

    w2d = weight.reshape(E, K).T.astype(compute_dtype)       # (K, E) bf16
    w2d = jnp.pad(w2d, ((0, 0), (0, Np - E)))
    b2d = jnp.pad(bias.astype(jnp.float32).reshape(1, E), ((0, 0), (0, Np - E)))

    out = _matmul_bias(patches, w2d, b2d, out_dtype=x.dtype)  # (M, Np) token-major
    out = out[:, :E]

    # Back to torch NCHW conv output, then the module's .view(B, -1, W').
    # TODO(synk): if downstream consumes token-major activations, return
    # out.reshape(B, Hp*Wp, E) directly and skip this transpose.
    conv_out = jnp.transpose(out.reshape(B, Hp, Wp, E), (0, 3, 1, 2))  # (B, E, H', W')
    return conv_out.reshape(B, E * Hp, Wp)


if __name__ == "__main__":
    # Small shapes consistent with the module: B=2, C=4, H=W=16, p=2, E=32.
    B, C, H, W = 2, 4, 16, 16
    patch_size = 2
    emb_size = 32

    key = jax.random.PRNGKey(0)
    kx, kw, kb = jax.random.split(key, 3)
    x = jax.random.normal(kx, (B, C, H, W), dtype=jnp.float32)
    weight = jax.random.normal(
        kw, (emb_size, C, patch_size, patch_size), dtype=jnp.float32) * 0.05
    bias = jax.random.normal(kb, (emb_size,), dtype=jnp.float32) * 0.05

    fwd = jax.jit(functools.partial(patch_embedding_forward, patch_size=patch_size))
    y = jax.block_until_ready(fwd(x, weight, bias))

    # Reference: pure-JAX conv on the same bf16-rounded inputs (kernel compute
    # dtype), f32 accumulation, then torch's .view(B, -1, W').
    xq = x.astype(jnp.bfloat16).astype(jnp.float32)
    wq = weight.astype(jnp.bfloat16).astype(jnp.float32)
    ref = jax.lax.conv_general_dilated(
        xq, wq, window_strides=(patch_size, patch_size), padding="VALID",
        dimension_numbers=("NCHW", "OIHW", "NCHW")) + bias[None, :, None, None]
    ref = ref.reshape(B, -1, ref.shape[-1])

    assert y.shape == (B, emb_size * (H // patch_size), W // patch_size)
    assert jnp.allclose(y, ref, atol=1e-3, rtol=1e-3), float(jnp.abs(y - ref).max())

    print("KERNEL_OK")
</pallas_src>

<mosaic_0001>
module attributes {stable_mosaic.version = 11 : i64} {
  func.func @_patch_embed_kernel(%arg0: i32, %arg1: memref<64x16xbf16, #tpu.memory_space<vmem>>, %arg2: memref<16x128xbf16, #tpu.memory_space<vmem>>, %arg3: memref<1x128xf32, #tpu.memory_space<vmem>>, %arg4: memref<64x128xf32, #tpu.memory_space<vmem>>) attributes {dimension_semantics = [#tpu.dimension_semantics<parallel>], iteration_bounds = array<i64: 2>, scalar_prefetch = 0 : i64, scratch_operands = 0 : i64, tpu.core_type = #tpu.core_type<tc>, window_params = [{transform_indices = @transform_0, window_bounds = array<i64: 64, 16>}, {pipeline_mode = #tpu.pipeline_mode<synchronous>, transform_indices = @transform_1, window_bounds = array<i64: 16, 128>}, {pipeline_mode = #tpu.pipeline_mode<synchronous>, transform_indices = @transform_2, window_bounds = array<i64: 1, 128>}, {transform_indices = @transform_3, window_bounds = array<i64: 64, 128>}]} {
    %c0 = arith.constant 0 : index
    %c0_0 = arith.constant 0 : index
    %0 = vector.load %arg1[%c0, %c0_0] : memref<64x16xbf16, #tpu.memory_space<vmem>>, vector<64x16xbf16>
    %c0_1 = arith.constant 0 : index
    %c0_2 = arith.constant 0 : index
    %1 = vector.load %arg2[%c0_1, %c0_2] : memref<16x128xbf16, #tpu.memory_space<vmem>>, vector<16x128xbf16>
    %cst = arith.constant dense<0.000000e+00> : vector<64x128xf32>
    %2 = tpu.matmul %0, %1, %cst {dimension_numbers = #tpu.dot_dimension_numbers<[1], [0], [0], [1], [0, 0, 1, 1], [], []>} : vector<64x16xbf16>, vector<16x128xbf16>, vector<64x128xf32> -> vector<64x128xf32>
    %c0_3 = arith.constant 0 : index
    %c0_4 = arith.constant 0 : index
    %3 = vector.load %arg3[%c0_3, %c0_4] : memref<1x128xf32, #tpu.memory_space<vmem>>, vector<1x128xf32>
    %4 = vector.broadcast %3 : vector<1x128xf32> to vector<64x128xf32>
    %5 = arith.addf %2, %4 : vector<64x128xf32>
    %c0_5 = arith.constant 0 : index
    %c0_6 = arith.constant 0 : index
    %6 = vector.load %arg4[%c0_5, %c0_6] : memref<64x128xf32, #tpu.memory_space<vmem>>, vector<64x128xf32>
    tpu.vector_store %arg4[%c0_5, %c0_6], %5 {strides = array<i32>} : memref<64x128xf32, #tpu.memory_space<vmem>>, vector<64x128xf32>,
    return
  }
  func.func @transform_0(%arg0: i32) -> (i32, i32) {
    %c0_i32 = arith.constant 0 : i32
    %c0_i32_0 = arith.constant 0 : i32
    return %arg0, %c0_i32 : i32, i32
  }
  func.func @transform_1(%arg0: i32) -> (i32, i32) {
    %c0_i32 = arith.constant 0 : i32
    %c0_i32_0 = arith.constant 0 : i32
    %c0_i32_1 = arith.constant 0 : i32
    return %c0_i32, %c0_i32_0 : i32, i32
  }
  func.func @transform_2(%arg0: i32) -> (i32, i32) {
    %c0_i32 = arith.constant 0 : i32
    %c0_i32_0 = arith.constant 0 : i32
    %c0_i32_1 = arith.constant 0 : i32
    return %c0_i32, %c0_i32_0 : i32, i32
  }
  func.func @transform_3(%arg0: i32) -> (i32, i32) {
    %c0_i32 = arith.constant 0 : i32
    %c0_i32_0 = arith.constant 0 : i32
    return %arg0, %c0_i32 : i32, i32
  }
}

</mosaic_0001>

<bundles_post_ra>
// kernel: patch_embedding_forward.1
= control target key start
LH: loop header
LB: loop body
LE: loop exit
PB: predicated region body
PF: predicated region fallthrough
CT: control target
= control target key end

     0   :  { %s439_s12 = smov 0   ;;  %s462_s0 = inlined_call_operand.vmem [shape: bf16[128,16], index: 0, kind: input, shape index: {}]   ;;  %s463_s1 = inlined_call_operand.vmem [shape: bf16[16,128], index: 1, kind: input, shape index: {}]   ;;  %s464_s2 = inlined_call_operand.vmem [shape: f32[1,128], index: 2, kind: input, shape index: {}]   ;;  %s465_s3 = inlined_call_operand.vmem [shape: f32[128,128], index: 3, kind: output, shape index: {}]  }
   0x1 LB: > { %s360_s13 = sadd.s32 4294967295, %s417_s12   ;;  %p364_p0 = scmp.ge.s32.totalorder %s417_s12, 1  ;;  %s417_s12 = sphi %s439_s12, %s13_s12  }
   0x2   : > { %p138_p1 = scmp.lt.s32.totalorder %s417_s12, 3 }
   0x4   : > { %p139_p2 = pnand %p364_p0, %p138_p1 }
   0x5   : > { %v406_v0 = vld [vmem:[%s463_s1] sm:$0xff] (!%p139_p2)   ;;  %s365_s16 = sshll.u32 (!%p139_p2), %s360_s13, 3  ;;  %vm218_vm0 = vcmask (!%p139_p2), 130048  }
   0x6   : > { %142 = sbr.rel (%p139_p2) target bundleno = 236 (0xec), region = 32  ;;  %p163_p3 = scmp.lt.s32.totalorder (!%p139_p2), %s365_s16, 15  ;;  %386 = vmatprep.subr.bf16.mxu0 (!%p139_p2), %v406_v0  ;;  %396 = vmatprep.subr.bf16.mxu1 (!%p139_p2), %v406_v0  ;;  %v369_v5 = vld [vmem:[%s464_s2] ss:$0 sm:$0xff] (!%p139_p2) }
   0x7   : > { %387 = vmatpush3.bf16.msra.mxu0 (!%p139_p2), %v406_v0  ;;  %397 = vmatpush3.bf16.msra.mxu1 (!%p139_p2), %v406_v0 }
   0xd   : > { %s467_s16 = smov (!%p163_p3, %s365_s16), 15 }
   0xe   : > { %s366_s17 = sshll.u32 %s467_s16, 2  ;;  %s368_s21 = sshll.u32 %s467_s16, 3 }
   0xf   : > { %s166_s20 = scalar_lea.vmem %s462_s0, %s366_s17  ;;  %s172_s26 = scalar_lea.vmem %s465_s3, %s368_s21 }
  0x10   : > { %v407_v1 = vld [vmem:[%s166_s20] sm:$0xff]   ;;  %v408_v2 = vld [vmem:[%s166_s20 + $0x10] sm:$0xff]   ;;  %v409_v3 = vld [vmem:[%s166_s20 + $0x8] sm:$0xff]  }
  0x11   : > { %388 = vmatprep.mubr.msk.bf16.mxu0 %vm218_vm0, %v407_v1  ;;  %392 = vmatprep.mubr.msk.bf16.mxu1 %vm218_vm0, %v408_v2  ;;  %v410_v4 = vld [vmem:[%s166_s20 + $0x18] sm:$0xff]  }
  0x12   : > { %389 = vmatmul.mubr.msk.bf16.vlgmr.msra.gmra.mrb[0].mxu0 %vm218_vm0, %v409_v3  ;;  %393 = vmatmul.mubr.msk.bf16.vlgmr.msra.gmra.mrb[0].mxu1 %vm218_vm0, %v410_v4 }
  0xe5   : > { %v390_v6 = vpop.f32.mrb[0].mxu0  ;;  %v394_v8 = vpop.f32.mrb[0].mxu1 }
  0xe6   : > { %v274_v7 = vadd.f32 %v390_v6, %v369_v5  ;;  %v265_v9 = vpop.f32.mrb[1].mxu0  ;;  %v290_v10 = vadd.f32 %v394_v8, %v369_v5  ;;  %v281_v12 = vpop.f32.mrb[1].mxu1 }
  0xe7   : > { %v266_v11 = vadd.f32 %v369_v5, %v265_v9  ;;  %v391_v13 = vpop.f32.mrb[2].mxu0  ;;  %v282_v14 = vadd.f32 %v369_v5, %v281_v12  ;;  %v395_v16 = vpop.f32.mrb[2].mxu1 }
  0xe8   : > { %298 = vst [vmem:[%s172_s26 + $0x10] sm:$0xff] %v274_v7  ;;  %v277_v15 = vadd.f32 %v391_v13, %v369_v5  ;;  %v268_v17 = vpop.f32.mrb[3].mxu0  ;;  %302 = vst [vmem:[%s172_s26 + $0x30] sm:$0xff] %v290_v10  ;;  %v293_v18 = vadd.f32 %v395_v16, %v369_v5  ;;  %v284_v20 = vpop.f32.mrb[3].mxu1 }
  0xe9   : > { %296 = vst [vmem:[%s172_s26] sm:$0xff] %v266_v11  ;;  %v269_v19 = vadd.f32 %v369_v5, %v268_v17  ;;  %300 = vst [vmem:[%s172_s26 + $0x20] sm:$0xff] %v282_v14  ;;  %v285_v21 = vadd.f32 %v369_v5, %v284_v20 }
  0xea   : > { %299 = vst [vmem:[%s172_s26 + $0x18] sm:$0xff] %v277_v15  ;;  %303 = vst [vmem:[%s172_s26 + $0x38] sm:$0xff] %v293_v18 }
  0xeb   : > { %297 = vst [vmem:[%s172_s26 + $0x8] sm:$0xff] %v269_v19  ;;  %301 = vst [vmem:[%s172_s26 + $0x28] sm:$0xff] %v285_v21 }
  0xec PF: > { %s13_s12 = sadd.s32 1, %s417_s12  }
  0xed   : > { %p10_p4 = scmp.ge.s32.totalorder %s13_s12, 4  }
  0xef   :  { %12 = sbr.rel (!%p10_p4) target bundleno = 1 (0x1), region = 62 }

</bundles_post_ra>
